<compile_context>
chip_gen: v7x
topology: tpu7x:2x2x1
jax: 0.10.0
libtpu: 0.0.40
codegen_flags: <defaults>
</compile_context>

<pallas_src>
import jax
import jax.numpy as jnp
from jax.experimental import pallas as pl
from jax.experimental.pallas import tpu as pltpu


def conv1x1_kernel(x_ref, w_ref, b_ref, o_ref):
    """One (batch-block, spatial-tile) block of a 1x1 conv.

    x_ref: (B_t, C_in, T_HW)   activation block (lane axis = spatial)
    w_ref: (C_out, C_in)       weights, grid-resident (constant index_map)
    b_ref: (C_out, 1)          bias, grid-resident
    o_ref: (B_t, C_out, T_HW)  output block (lane-dense stores)
    """
    w = w_ref[...]
    bias = b_ref[...].astype(jnp.float32)          # (C_out, 1), lane-broadcast
    b_t = x_ref.shape[0]
    # Small static unrolled loop over the batch rows in this block; each row
    # is one MXU matmul with f32 accumulation (K is tiny here, but the MXU is
    # otherwise idle and the contraction hides entirely under the DMA).
    for b in range(b_t):
        acc = jnp.dot(w, x_ref[b], preferred_element_type=jnp.float32)
        o_ref[b] = (acc + bias).astype(o_ref.dtype)


def conv2d_1x1(x_nchw, weight_oihw, bias, *, tile_hw=32768,
               allow_fallback=True, vmem_budget_bytes=24 * 1024 * 1024):
    """1x1 Conv2d (stride 1, no padding) with bias, matching torch semantics.

    x_nchw:      (N, C_in, H, W)
    weight_oihw: (C_out, C_in, 1, 1)
    bias:        (C_out,)
    returns:     (N, C_out, H, W)
    """
    N, C_in, H, W = x_nchw.shape
    C_out = weight_oihw.shape[0]
    HW = H * W

    w_mat = weight_oihw.reshape(C_out, C_in)       # (C_out, C_in)
    b_col = bias.reshape(C_out, 1)                 # (C_out, 1)

    # Degenerate sizes: a pallas_call is pure launch/step overhead; let XLA
    # fuse it instead.
    if allow_fallback and N * HW * C_out <= 4096:
        out = jnp.einsum("nchw,oc->nohw", x_nchw, w_mat) + bias.reshape(1, C_out, 1, 1)
        return out.astype(x_nchw.dtype)

    # Native-layout view: pure reshape, no data movement.
    x_mat = x_nchw.reshape(N, C_in, HW)            # (N, C_in, HW)

    # --- Tile selection -----------------------------------------------------
    # Per spatial column, per grid step: input + output, double-buffered.
    itemsize = x_nchw.dtype.itemsize
    bytes_per_col = 2 * (C_in + C_out) * itemsize
    max_cols = max(128, vmem_budget_bytes // max(bytes_per_col, 1))
    # Clamp the requested tile to the VMEM budget and round to a multiple of
    # 128 so tiled blocks satisfy the (8, 128) lane-divisibility rule.
    t_target = max(128, min(int(tile_hw), int(max_cols)))
    t_target = (t_target // 128) * 128
    # TODO(synk): for very large C_in/C_out, also single-buffer the constant
    # weight block (pipeline_mode=pl.Buffered(1)) / cast weights to bf16 and
    # tile the K axis; irrelevant for C_in=8, C_out=32 (weight is ~1 KiB).

    if HW > t_target:
        # Spatial tiling; last tile may be ragged (handled by Pallas OOB
        # semantics, no wrapper pad/slice needed).
        t_hw = t_target
        b_t = 1
    else:
        # Small spatial extent: pack several batches into one grid step.
        t_hw = HW
        b_t = min(N, max(1, t_target // max(HW, 1)))
        while N % b_t:                 # keep batch blocks exact (no raggedness)
            b_t -= 1
        # v7x has 2 TensorCores: if everything collapsed into a single grid
        # step and the work is non-trivial, split the spatial axis into >=2
        # lane-aligned tiles so both cores get a share.
        if N // b_t == 1 and HW >= 2048:
            t_hw = pl.cdiv(pl.cdiv(HW, 2), 128) * 128
            # b_t stays as-is; grid becomes (1, >=2).

    grid = (N // b_t, pl.cdiv(HW, t_hw))

    out = pl.pallas_call(
        conv1x1_kernel,
        out_shape=jax.ShapeDtypeStruct((N, C_out, HW), x_nchw.dtype),
        grid=grid,
        in_specs=[
            pl.BlockSpec((b_t, C_in, t_hw), lambda n, t: (n, 0, t)),
            pl.BlockSpec((C_out, C_in), lambda n, t: (0, 0)),
            pl.BlockSpec((C_out, 1), lambda n, t: (0, 0)),
        ],
        out_specs=pl.BlockSpec((b_t, C_out, t_hw), lambda n, t: (n, 0, t)),
        compiler_params=pltpu.CompilerParams(
            dimension_semantics=("parallel", "parallel")),
    )(x_mat, w_mat, b_col)

    return out.reshape(N, C_out, H, W)


if __name__ == "__main__":
    key = jax.random.PRNGKey(0)
    k_x, k_w, k_b, k_x2, k_x3 = jax.random.split(key, 5)

    # Shapes from the module: Conv2d(8, 32, kernel_size=1) on input [1, 8, 1, 1].
    x = jax.random.normal(k_x, (1, 8, 1, 1), dtype=jnp.float32)
    weight = jax.random.normal(k_w, (32, 8, 1, 1), dtype=jnp.float32) * 0.1
    bias = jax.random.normal(k_b, (32,), dtype=jnp.float32) * 0.1
    w2d = weight.reshape(32, 8)

    def ref_fn(xx):
        return jnp.einsum("nchw,oc->nohw", xx, w2d) + bias.reshape(1, 32, 1, 1)

    # 1) Spec shape (degenerate size -> fused XLA fallback path).
    out = conv2d_1x1(x, weight, bias)
    jax.block_until_ready(out)
    assert out.shape == (1, 32, 1, 1)
    assert jnp.allclose(out, ref_fn(x), atol=1e-5), "mismatch (spec shape, fallback)"

    # 2) Spec shape forced through the Pallas kernel.
    out_p = conv2d_1x1(x, weight, bias, allow_fallback=False)
    jax.block_until_ready(out_p)
    assert out_p.shape == (1, 32, 1, 1)
    assert jnp.allclose(out_p, ref_fn(x), atol=1e-5), "mismatch (spec shape, pallas)"

    # 3) Tiled spatial path with a ragged last tile (HW=1600, t_hw=512 -> 4 tiles,
    #    no wrapper pad/slice).
    x2 = jax.random.normal(k_x2, (2, 8, 40, 40), dtype=jnp.float32)
    out2 = conv2d_1x1(x2, weight, bias, tile_hw=512)
    jax.block_until_ready(out2)
    assert out2.shape == (2, 32, 40, 40)
    assert jnp.allclose(out2, ref_fn(x2), atol=1e-4), "mismatch (tiled/ragged path)"

    # 4) Batch-blocked path for small HW with N > 1 (HW=144, all 4 batches in
    #    one grid step).
    x3 = jax.random.normal(k_x3, (4, 8, 12, 12), dtype=jnp.float32)
    out3 = conv2d_1x1(x3, weight, bias)
    jax.block_until_ready(out3)
    assert out3.shape == (4, 32, 12, 12)
    assert jnp.allclose(out3, ref_fn(x3), atol=1e-4), "mismatch (batch-blocked path)"

    print("KERNEL_OK")
</pallas_src>

<mosaic_0001>
module attributes {stable_mosaic.version = 11 : i64} {
  func.func @conv1x1_kernel(%arg0: i32, %arg1: i32, %arg2: memref<1x8x1xf32, #tpu.memory_space<vmem>>, %arg3: memref<32x8xf32, #tpu.memory_space<vmem>>, %arg4: memref<32x1xf32, #tpu.memory_space<vmem>>, %arg5: memref<1x32x1xf32, #tpu.memory_space<vmem>>) attributes {dimension_semantics = [#tpu.dimension_semantics<parallel>, #tpu.dimension_semantics<parallel>], iteration_bounds = array<i64: 1, 1>, scalar_prefetch = 0 : i64, scratch_operands = 0 : i64, tpu.core_type = #tpu.core_type<tc>, window_params = [{transform_indices = @transform_0, window_bounds = array<i64: 1, 8, 1>}, {pipeline_mode = #tpu.pipeline_mode<synchronous>, transform_indices = @transform_1, window_bounds = array<i64: 32, 8>}, {pipeline_mode = #tpu.pipeline_mode<synchronous>, transform_indices = @transform_2, window_bounds = array<i64: 32, 1>}, {transform_indices = @transform_3, window_bounds = array<i64: 1, 32, 1>}]} {
    %c0 = arith.constant 0 : index
    %c0_0 = arith.constant 0 : index
    %0 = vector.load %arg3[%c0, %c0_0] : memref<32x8xf32, #tpu.memory_space<vmem>>, vector<32x8xf32>
    %c0_1 = arith.constant 0 : index
    %c0_2 = arith.constant 0 : index
    %1 = vector.load %arg4[%c0_1, %c0_2] : memref<32x1xf32, #tpu.memory_space<vmem>>, vector<32x1xf32>
    %c0_3 = arith.constant 0 : index
    %c0_4 = arith.constant 0 : index
    %c0_5 = arith.constant 0 : index
    %2 = vector.load %arg2[%c0_3, %c0_4, %c0_5] : memref<1x8x1xf32, #tpu.memory_space<vmem>>, vector<1x8x1xf32>
    %3 = vector.shape_cast %2 : vector<1x8x1xf32> to vector<8x1xf32>
    %cst = arith.constant dense<0.000000e+00> : vector<32x1xf32>
    %4 = tpu.matmul %0, %3, %cst {dimension_numbers = #tpu.dot_dimension_numbers<[1], [0], [0], [1], [0, 0, 1, 1], [], []>} : vector<32x8xf32>, vector<8x1xf32>, vector<32x1xf32> -> vector<32x1xf32>
    %5 = arith.addf %4, %1 : vector<32x1xf32>
    %c0_6 = arith.constant 0 : index
    %c0_7 = arith.constant 0 : index
    %c0_8 = arith.constant 0 : index
    %6 = vector.load %arg5[%c0_6, %c0_7, %c0_8] : memref<1x32x1xf32, #tpu.memory_space<vmem>>, vector<1x32x1xf32>
    %7 = vector.shape_cast %6 : vector<1x32x1xf32> to vector<32x1xf32>
    %8 = vector.shape_cast %5 : vector<32x1xf32> to vector<1x32x1xf32>
    tpu.vector_store %arg5[%c0_6, %c0_7, %c0_8], %8 {strides = array<i32>} : memref<1x32x1xf32, #tpu.memory_space<vmem>>, vector<1x32x1xf32>,
    return
  }
  func.func @transform_0(%arg0: i32, %arg1: i32) -> (i32, i32, i32) {
    %c0_i32 = arith.constant 0 : i32
    %c0_i32_0 = arith.constant 0 : i32
    return %arg0, %c0_i32, %arg1 : i32, i32, i32
  }
  func.func @transform_1(%arg0: i32, %arg1: i32) -> (i32, i32) {
    %c0_i32 = arith.constant 0 : i32
    %c0_i32_0 = arith.constant 0 : i32
    %c0_i32_1 = arith.constant 0 : i32
    return %c0_i32, %c0_i32_0 : i32, i32
  }
  func.func @transform_2(%arg0: i32, %arg1: i32) -> (i32, i32) {
    %c0_i32 = arith.constant 0 : i32
    %c0_i32_0 = arith.constant 0 : i32
    %c0_i32_1 = arith.constant 0 : i32
    return %c0_i32, %c0_i32_0 : i32, i32
  }
  func.func @transform_3(%arg0: i32, %arg1: i32) -> (i32, i32, i32) {
    %c0_i32 = arith.constant 0 : i32
    %c0_i32_0 = arith.constant 0 : i32
    return %arg0, %c0_i32, %arg1 : i32, i32, i32
  }
}

</mosaic_0001>

<bundles_post_ra>
// kernel: tpu_custom_call.1
= control target key start
LH: loop header
LB: loop body
LE: loop exit
PB: predicated region body
PF: predicated region fallthrough
CT: control target
= control target key end

     0   :  { %vm23_vm0 = vcmask 64512   ;;  %vm121_vm1 = vcmask 7168   ;;  %s208_s0 = inlined_call_operand.vmem [shape: f32[1,8,1], index: 0, kind: input, shape index: {}]   ;;  %s209_s1 = inlined_call_operand.vmem [shape: f32[32,8], index: 1, kind: input, shape index: {}]   ;;  %s210_s2 = inlined_call_operand.vmem [shape: f32[32,1], index: 2, kind: input, shape index: {}]   ;;  %s211_s3 = inlined_call_operand.vmem [shape: f32[1,32,1], index: 3, kind: output, shape index: {}]  }
   0x1   :  { %v22_v0 = vld [vmem:[%s208_s0] sm:$0xff]  ;;  %v16_v2 = vld [vmem:[%s209_s1 + $0x10] sm:$0xff]  ;;  %v15_v3 = vld [vmem:[%s209_s1 + $0x8] sm:$0xff] }
   0x2   :  { %v14_v1 = vld [vmem:[%s209_s1] sm:$0xff]  ;;  %139 = vmatprep.subr.mxu0 %v22_v0  ;;  %147 = vmatprep.subr.mxu1 %v22_v0  ;;  %v17_v4 = vld [vmem:[%s209_s1 + $0x18] sm:$0xff]  ;;  %v19_v5 = vld [vmem:[%s210_s2 + $0x8] sm:$0xff] }
   0x3   :  { %140 = vmatpush3.msra.mxu0 %v22_v0  ;;  %148 = vmatpush3.msra.mxu1 %v22_v0  ;;  %v21_v6 = vld [vmem:[%s210_s2 + $0x18] sm:$0xff]  ;;  %v18_v7 = vld [vmem:[%s210_s2] sm:$0xff]  ;;  %v20_v8 = vld [vmem:[%s210_s2 + $0x10] sm:$0xff] }
   0x4   :  { %141 = vmatprep.mubr.msk.f32.mxu0 %vm23_vm0, %v14_v1  ;;  %144 = vmatprep.mubr.msk.f32.mxu1 %vm23_vm0, %v16_v2 }
   0x5   :  { %142 = vmatmul.mubr.msk.f32.vlgmr.msra.gmra.mrb[0].mxu0 %vm23_vm0, %v15_v3  ;;  %145 = vmatmul.mubr.msk.f32.vlgmr.msra.gmra.mrb[0].mxu1 %vm23_vm0, %v17_v4 }
  0xd8   :  { %v143_v9 = vpop.f32.mrb[0].mxu0  ;;  %v146_v10 = vpop.f32.mrb[0].mxu1 }
  0xd9   :  { %v108_v11 = vadd.f32 %v143_v9, %v19_v5  ;;  %v118_v12 = vadd.f32 %v146_v10, %v21_v6  ;;  %v102_v13 = vpop.f32.mrb[1].mxu0  ;;  %v112_v14 = vpop.f32.mrb[1].mxu1 }
  0xda   :  { %v103_v15 = vadd.f32 %v102_v13, %v18_v7  ;;  %v113_v16 = vadd.f32 %v112_v14, %v20_v8 }
  0xdb   :  { %123 = vst.msk [vmem:[%s211_s3 + $0x8] sm:$0xff] %vm121_vm1, %v108_v11  ;;  %125 = vst.msk [vmem:[%s211_s3 + $0x18] sm:$0xff] %vm121_vm1, %v118_v12 }
  0xdc   :  { %122 = vst.msk [vmem:[%s211_s3] sm:$0xff] %vm121_vm1, %v103_v15  ;;  %124 = vst.msk [vmem:[%s211_s3 + $0x10] sm:$0xff] %vm121_vm1, %v113_v16 }

</bundles_post_ra>
